<compile_context>
chip_gen: v7x
topology: tpu7x:2x2x1
jax: 0.10.0
libtpu: 0.0.40
codegen_flags: <defaults>
</compile_context>

<pallas_src>
import functools

import jax
import jax.numpy as jnp
from jax import lax
from jax.experimental import pallas as pl
from jax.experimental.pallas import tpu as pltpu


# ----------------------------------------------------------------------------
# helpers
# ----------------------------------------------------------------------------
def round_up(x, m):
    return (x + m - 1) // m * m


def padded_k(K):
    """K (reduction) dimension padding rule shared by build-time and trace-time."""
    return round_up(K, 128)


def pick_tk(Kp):
    """Largest K tile: single K step when it fits, else a large divisor of Kp."""
    if Kp <= 3072:
        return Kp
    for cand in range(2048, 0, -128):
        if Kp % cand == 0:
            return cand
    return 128


# ----------------------------------------------------------------------------
# Pallas GEMM kernel: out = [relu]( x @ w + bias [+ residual] )
#   x: bf16 (tm, tk)   w: bf16 (tk, tn)   bias: f32 (1, tn)
#   residual (optional): bf16 (tm, tn)    out: bf16 (tm, tn)
#   acc: f32 VMEM scratch, accumulated across the (innermost, arbitrary) K axis.
# ----------------------------------------------------------------------------
def _gemm_kernel(*refs, relu, has_res):
    if has_res:
        x_ref, w_ref, b_ref, r_ref, o_ref, acc_ref = refs
    else:
        x_ref, w_ref, b_ref, o_ref, acc_ref = refs
        r_ref = None

    @pl.when(pl.program_id(2) == 0)
    def _():
        acc_ref[...] = jnp.zeros_like(acc_ref)

    acc_ref[...] += jnp.dot(x_ref[...], w_ref[...],
                            preferred_element_type=jnp.float32)

    @pl.when(pl.program_id(2) == pl.num_programs(2) - 1)
    def _():
        y = acc_ref[...] + b_ref[...]
        if has_res:
            y = y + r_ref[...].astype(jnp.float32)
        if relu:
            y = jnp.maximum(y, 0.0)
        o_ref[...] = y.astype(o_ref.dtype)


def gemm_bias_act(x, wmat, bias, residual=None, relu=False):
    """relu((x @ wmat) + bias [+ residual]).

    x: (M, K) bf16 (K unpadded).  wmat: (Kp, Nout) bf16, Kp = padded_k(K),
    BN scale already folded in.  bias: (Nout,) f32.  residual: (M, Nout) bf16.
    """
    x = x.astype(jnp.bfloat16)
    M, K = x.shape
    Kp, Nout = wmat.shape
    assert Kp == padded_k(K), (Kp, K)
    Np = round_up(Nout, 128)

    tm = min(256, round_up(M, 16))
    Mp = round_up(M, tm)
    tn = 256 if Np % 256 == 0 else 128
    tk = pick_tk(Kp)

    xp = jnp.pad(x, ((0, Mp - M), (0, Kp - K)))
    wp = wmat if Np == Nout else jnp.pad(wmat, ((0, 0), (0, Np - Nout)))
    bp = jnp.pad(bias.astype(jnp.float32), (0, Np - Nout)).reshape(1, Np)

    inputs = [xp, wp, bp]
    in_specs = [
        pl.BlockSpec((tm, tk), lambda i, j, k: (i, k)),
        pl.BlockSpec((tk, tn), lambda i, j, k: (k, j)),
        pl.BlockSpec((1, tn), lambda i, j, k: (0, j)),
    ]
    has_res = residual is not None
    if has_res:
        rp = jnp.pad(residual.astype(jnp.bfloat16),
                     ((0, Mp - M), (0, Np - Nout)))
        inputs.append(rp)
        in_specs.append(pl.BlockSpec((tm, tn), lambda i, j, k: (i, j)))

    grid = (Mp // tm, Np // tn, Kp // tk)
    out = pl.pallas_call(
        functools.partial(_gemm_kernel, relu=relu, has_res=has_res),
        out_shape=jax.ShapeDtypeStruct((Mp, Np), jnp.bfloat16),
        grid_spec=pltpu.PrefetchScalarGridSpec(
            num_scalar_prefetch=0,
            grid=grid,
            in_specs=in_specs,
            out_specs=pl.BlockSpec((tm, tn), lambda i, j, k: (i, j)),
            scratch_shapes=[pltpu.VMEM((tm, tn), jnp.float32)],
        ),
        compiler_params=pltpu.CompilerParams(
            dimension_semantics=("parallel", "parallel", "arbitrary")),
    )(*inputs)
    return out[:M, :Nout]


# ----------------------------------------------------------------------------
# conv / pool wrappers (glue in JAX, compute in Pallas)
# ----------------------------------------------------------------------------
def im2col(x, kh, kw, stride, padding):
    """x: NHWC bf16 -> patches (N*OH*OW, kh*kw*C), plus output spatial dims."""
    N, H, W, C = x.shape
    xp = jnp.pad(x, ((0, 0), (padding, padding), (padding, padding), (0, 0)))
    Hp, Wp = H + 2 * padding, W + 2 * padding
    OH = (Hp - kh) // stride + 1
    OW = (Wp - kw) // stride + 1
    cols = []
    for i in range(kh):
        for j in range(kw):
            cols.append(xp[:, i:i + stride * (OH - 1) + 1:stride,
                           j:j + stride * (OW - 1) + 1:stride, :])
    patches = jnp.stack(cols, axis=3)                 # (N, OH, OW, kh*kw, C)
    return patches.reshape(N * OH * OW, kh * kw * C), (N, OH, OW)


def conv2d(x, p, k, stride=1, padding=0, relu=False, residual=None):
    """NHWC conv via Pallas GEMM.  p: {'wmat': (Kp, Cout) bf16, 'bias': (Cout,) f32}."""
    Cin = x.shape[-1]
    patches, (N, OH, OW) = im2col(x, k, k, stride, padding)
    assert p["wmat"].shape[0] == padded_k(k * k * Cin)
    res_flat = None
    if residual is not None:
        res_flat = residual.reshape(N * OH * OW, residual.shape[-1])
    out = gemm_bias_act(patches, p["wmat"], p["bias"],
                        residual=res_flat, relu=relu)
    Nout = p["wmat"].shape[1]
    return out.reshape(N, OH, OW, Nout)


def maxpool2d_3x3_s2(x):
    """MaxPool2d(kernel=3, stride=2, padding=1), NHWC, pairwise-max tree.

    Single fused XLA elementwise pass over shifted strided slices; avoids the
    previous 9x stacked HBM materialization + extra kernel launch.
    """
    N, H, W, C = x.shape
    xp = jnp.pad(x, ((0, 0), (1, 1), (1, 1), (0, 0)),
                 constant_values=-jnp.inf)
    OH = (H + 2 - 3) // 2 + 1
    OW = (W + 2 - 3) // 2 + 1
    out = None
    for i in range(3):
        for j in range(3):
            sl = xp[:, i:i + 2 * (OH - 1) + 1:2,
                    j:j + 2 * (OW - 1) + 1:2, :]
            out = sl if out is None else jnp.maximum(out, sl)
    return out


def upsample2x(x):
    """nn.Upsample(scale_factor=2, mode='nearest'), NHWC."""
    return jnp.repeat(jnp.repeat(x, 2, axis=1), 2, axis=2)


# ----------------------------------------------------------------------------
# deterministic parameter construction (synthetic weights, PyTorch semantics)
# Weight preprocessing (transpose/reshape, BN-scale folding, K padding, bf16
# cast) is done ONCE here, not per forward call.
# ----------------------------------------------------------------------------
class ParamGen:
    def __init__(self, seed=0):
        self.key = jax.random.PRNGKey(seed)
        self.count = 0

    def next(self, shape, scale=1.0):
        self.count += 1
        k = jax.random.fold_in(self.key, self.count)
        return jax.random.normal(k, shape, jnp.float32) * scale


def _fold_conv(w_oihw, scale, bias):
    """OIHW conv weight + per-channel scale/bias -> prepadded bf16 GEMM weight."""
    Cout, Cin, KH, KW = w_oihw.shape
    wmat = jnp.transpose(w_oihw, (2, 3, 1, 0)).reshape(KH * KW * Cin, Cout)
    wmat = wmat * scale[None, :]                      # fold BN scale (f32)
    K = KH * KW * Cin
    Kp = padded_k(K)
    wmat = jnp.pad(wmat, ((0, Kp - K), (0, 0))).astype(jnp.bfloat16)
    return {"wmat": wmat, "bias": bias.astype(jnp.float32)}


def make_convbn(pg, cin, cout, k):
    """Conv2d(bias=False) + BatchNorm2d (inference) folded into the weights."""
    w = pg.next((cout, cin, k, k), 0.05)
    gamma = 1.0 + 0.1 * pg.next((cout,))
    beta = 0.1 * pg.next((cout,))
    mean = 0.1 * pg.next((cout,))
    var = 1.0 + 0.1 * jnp.abs(pg.next((cout,)))
    scale = gamma / jnp.sqrt(var + 1e-5)
    bias = beta - scale * mean
    return _fold_conv(w, scale, bias)


def make_convbias(pg, cin, cout, k):
    """Conv2d with bias (convrelu / conv_last)."""
    w = pg.next((cout, cin, k, k), 0.05)
    b = 0.1 * pg.next((cout,))
    return _fold_conv(w, jnp.ones((cout,), jnp.float32), b)


# (cin, cout, stride) per BasicBlock — ResNet-34
LAYER_CFG = {
    "layer1": [(64, 64, 1)] * 3,
    "layer2": [(64, 128, 2)] + [(128, 128, 1)] * 3,
    "layer3": [(128, 256, 2)] + [(256, 256, 1)] * 5,
    "layer4": [(256, 512, 2)] + [(512, 512, 1)] * 2,
}


def build_params(n_class, seed=0):
    pg = ParamGen(seed)
    P = {}
    P["conv1"] = make_convbn(pg, 3, 64, 7)                  # resnet stem
    for name, cfg in LAYER_CFG.items():
        blocks = []
        for cin, cout, stride in cfg:
            b = {"conv1": make_convbn(pg, cin, cout, 3),
                 "conv2": make_convbn(pg, cout, cout, 3)}
            if stride != 1 or cin != cout:
                b["down"] = make_convbn(pg, cin, cout, 1)
            blocks.append(b)
        P[name] = blocks
    P["layer0_1x1"] = make_convbias(pg, 64, 64, 1)
    P["layer1_1x1"] = make_convbias(pg, 64, 64, 1)
    P["layer2_1x1"] = make_convbias(pg, 128, 128, 1)
    P["layer3_1x1"] = make_convbias(pg, 256, 256, 1)
    P["layer4_1x1"] = make_convbias(pg, 512, 512, 1)
    P["conv_up3"] = make_convbias(pg, 256 + 512, 512, 3)
    P["conv_up2"] = make_convbias(pg, 128 + 512, 256, 3)
    P["conv_up1"] = make_convbias(pg, 64 + 256, 256, 3)
    P["conv_up0"] = make_convbias(pg, 64 + 256, 128, 3)
    P["conv_original_size0"] = make_convbias(pg, 3, 64, 3)
    P["conv_original_size1"] = make_convbias(pg, 64, 64, 3)
    P["conv_original_size2"] = make_convbias(pg, 64 + 128, 64, 3)
    P["conv_last"] = make_convbias(pg, 64, n_class, 1)
    # conv_resize is defined in __init__ but never used in forward() — omitted.
    return P


# ----------------------------------------------------------------------------
# forward pass
# ----------------------------------------------------------------------------
def basic_block(x, p, stride, has_down):
    if has_down:
        identity = conv2d(x, p["down"], k=1, stride=stride, padding=0,
                          relu=False)
    else:
        identity = x
    out = conv2d(x, p["conv1"], k=3, stride=stride, padding=1, relu=True)
    # second conv: residual add + ReLU fused into the GEMM epilogue
    out = conv2d(out, p["conv2"], k=3, stride=1, padding=1, relu=True,
                 residual=identity)
    return out


def run_layer(x, layer_params, cfg):
    for bp, (cin, cout, stride) in zip(layer_params, cfg):
        x = basic_block(x, bp, stride, has_down=(stride != 1 or cin != cout))
    return x


def resnet_unet_forward(x_nchw, params, include_1x1=None):
    if include_1x1 is None:
        include_1x1 = {"layer0": True, "layer1": True, "layer2": True,
                       "layer3": True, "layer4": True}
    x = jnp.transpose(x_nchw, (0, 2, 3, 1)).astype(jnp.bfloat16)   # NHWC bf16

    x_original = conv2d(x, params["conv_original_size0"], k=3, padding=1,
                        relu=True)
    x_original = conv2d(x_original, params["conv_original_size1"], k=3,
                        padding=1, relu=True)

    # layer0 = conv1(7x7, s2, p3) + BN + ReLU
    layer0 = conv2d(x, params["conv1"], k=7, stride=2, padding=3, relu=True)
    # layer1 = maxpool + resnet layer1
    layer1 = maxpool2d_3x3_s2(layer0)
    layer1 = run_layer(layer1, params["layer1"], LAYER_CFG["layer1"])
    layer2 = run_layer(layer1, params["layer2"], LAYER_CFG["layer2"])
    layer3 = run_layer(layer2, params["layer3"], LAYER_CFG["layer3"])
    layer4 = run_layer(layer3, params["layer4"], LAYER_CFG["layer4"])

    if include_1x1["layer4"]:
        layer4 = conv2d(layer4, params["layer4_1x1"], k=1, relu=True)
    u = upsample2x(layer4)
    if include_1x1["layer3"]:
        layer3 = conv2d(layer3, params["layer3_1x1"], k=1, relu=True)
    u = jnp.concatenate([u, layer3], axis=-1)
    u = conv2d(u, params["conv_up3"], k=3, padding=1, relu=True)

    u = upsample2x(u)
    if include_1x1["layer2"]:
        layer2 = conv2d(layer2, params["layer2_1x1"], k=1, relu=True)
    u = jnp.concatenate([u, layer2], axis=-1)
    u = conv2d(u, params["conv_up2"], k=3, padding=1, relu=True)

    u = upsample2x(u)
    if include_1x1["layer1"]:
        layer1 = conv2d(layer1, params["layer1_1x1"], k=1, relu=True)
    u = jnp.concatenate([u, layer1], axis=-1)
    u = conv2d(u, params["conv_up1"], k=3, padding=1, relu=True)

    u = upsample2x(u)
    if include_1x1["layer0"]:
        layer0 = conv2d(layer0, params["layer0_1x1"], k=1, relu=True)
    u = jnp.concatenate([u, layer0], axis=-1)
    u = conv2d(u, params["conv_up0"], k=3, padding=1, relu=True)

    u = upsample2x(u)
    u = jnp.concatenate([u, x_original], axis=-1)
    u = conv2d(u, params["conv_original_size2"], k=3, padding=1, relu=True)

    out = conv2d(u, params["conv_last"], k=1, relu=False)           # NHWC
    return jnp.transpose(out, (0, 3, 1, 2)).astype(jnp.float32)     # NCHW f32


# ----------------------------------------------------------------------------
# main
# ----------------------------------------------------------------------------
if __name__ == "__main__":
    n_class = 5
    params = build_params(n_class, seed=0)

    key = jax.random.PRNGKey(0)
    x = jax.random.normal(key, (2, 3, 64, 64), jnp.float32)   # NCHW, like PyTorch

    # quick self-check of the Pallas conv path against lax.conv (bf16-consistent)
    p0 = params["conv_original_size0"]
    x_nhwc = jnp.transpose(x, (0, 2, 3, 1)).astype(jnp.bfloat16)
    w_hwio = p0["wmat"][:27].reshape(3, 3, 3, 64)             # (KH,KW,Cin,Cout)
    ref = lax.conv_general_dilated(
        x_nhwc, w_hwio, window_strides=(1, 1), padding=((1, 1), (1, 1)),
        dimension_numbers=("NHWC", "HWIO", "NHWC"),
        preferred_element_type=jnp.float32)
    ref = jnp.maximum(ref + p0["bias"], 0.0)
    got = conv2d(x_nhwc, p0, k=3, padding=1, relu=True).astype(jnp.float32)
    assert jnp.allclose(got, ref, atol=5e-2, rtol=5e-2), "conv self-check failed"

    fwd = jax.jit(resnet_unet_forward)
    out = fwd(x, params)
    out = jax.block_until_ready(out)
    assert out.shape == (2, n_class, 64, 64), out.shape
    print("KERNEL_OK")
</pallas_src>

<mosaic_0001>
module attributes {stable_mosaic.version = 11 : i64} {
  func.func @_gemm_kernel(%arg0: i32, %arg1: i32, %arg2: i32, %arg3: memref<256x128xbf16, #tpu.memory_space<vmem>>, %arg4: memref<128x128xbf16, #tpu.memory_space<vmem>>, %arg5: memref<1x128xf32, #tpu.memory_space<vmem>>, %arg6: memref<256x128xbf16, #tpu.memory_space<vmem>>, %arg7: memref<256x128xf32, #tpu.memory_space<vmem>>) attributes {dimension_semantics = [#tpu.dimension_semantics<parallel>, #tpu.dimension_semantics<parallel>, #tpu.dimension_semantics<arbitrary>], iteration_bounds = array<i64: 32, 1, 1>, scalar_prefetch = 0 : i64, scratch_operands = 1 : i64, tpu.core_type = #tpu.core_type<tc>, window_params = [{transform_indices = @transform_0, window_bounds = array<i64: 256, 128>}, {transform_indices = @transform_1, window_bounds = array<i64: 128, 128>}, {transform_indices = @transform_2, window_bounds = array<i64: 1, 128>}, {transform_indices = @transform_3, window_bounds = array<i64: 256, 128>}]} {
    %c0_i32 = arith.constant 0 : i32
    %0 = arith.cmpi eq, %arg2, %c0_i32 : i32
    %1 = arith.extui %0 : i1 to i32
    %c0_i32_0 = arith.constant 0 : i32
    %2 = arith.cmpi ne, %1, %c0_i32_0 : i32
    scf.if %2 {
      %cst_10 = arith.constant 0.000000e+00 : f32
      %12 = vector.broadcast %cst_10 : f32 to vector<256x128xf32>
      %c0_11 = arith.constant 0 : index
      %c0_12 = arith.constant 0 : index
      %13 = vector.load %arg7[%c0_11, %c0_12] : memref<256x128xf32, #tpu.memory_space<vmem>>, vector<256x128xf32>
      tpu.vector_store %arg7[%c0_11, %c0_12], %12 {strides = array<i32>} : memref<256x128xf32, #tpu.memory_space<vmem>>, vector<256x128xf32>,
    } else {
    }
    %c0 = arith.constant 0 : index
    %c0_1 = arith.constant 0 : index
    %3 = vector.load %arg7[%c0, %c0_1] : memref<256x128xf32, #tpu.memory_space<vmem>>, vector<256x128xf32>
    %c0_2 = arith.constant 0 : index
    %c0_3 = arith.constant 0 : index
    %4 = vector.load %arg3[%c0_2, %c0_3] : memref<256x128xbf16, #tpu.memory_space<vmem>>, vector<256x128xbf16>
    %c0_4 = arith.constant 0 : index
    %c0_5 = arith.constant 0 : index
    %5 = vector.load %arg4[%c0_4, %c0_5] : memref<128x128xbf16, #tpu.memory_space<vmem>>, vector<128x128xbf16>
    %cst = arith.constant dense<0.000000e+00> : vector<256x128xf32>
    %6 = tpu.matmul %4, %5, %cst {dimension_numbers = #tpu.dot_dimension_numbers<[1], [0], [0], [1], [0, 0, 1, 1], [], []>} : vector<256x128xbf16>, vector<128x128xbf16>, vector<256x128xf32> -> vector<256x128xf32>
    %7 = arith.addf %3, %6 : vector<256x128xf32>
    %c0_6 = arith.constant 0 : index
    %c0_7 = arith.constant 0 : index
    %8 = vector.load %arg7[%c0_6, %c0_7] : memref<256x128xf32, #tpu.memory_space<vmem>>, vector<256x128xf32>
    tpu.vector_store %arg7[%c0_6, %c0_7], %7 {strides = array<i32>} : memref<256x128xf32, #tpu.memory_space<vmem>>, vector<256x128xf32>,
    %c0_i32_8 = arith.constant 0 : i32
    %9 = arith.cmpi eq, %arg2, %c0_i32_8 : i32
    %10 = arith.extui %9 : i1 to i32
    %c0_i32_9 = arith.constant 0 : i32
    %11 = arith.cmpi ne, %10, %c0_i32_9 : i32
    scf.if %11 {
      %c0_10 = arith.constant 0 : index
      %c0_11 = arith.constant 0 : index
      %12 = vector.load %arg7[%c0_10, %c0_11] : memref<256x128xf32, #tpu.memory_space<vmem>>, vector<256x128xf32>
      %c0_12 = arith.constant 0 : index
      %c0_13 = arith.constant 0 : index
      %13 = vector.load %arg5[%c0_12, %c0_13] : memref<1x128xf32, #tpu.memory_space<vmem>>, vector<1x128xf32>
      %14 = vector.broadcast %13 : vector<1x128xf32> to vector<256x128xf32>
      %15 = arith.addf %12, %14 : vector<256x128xf32>
      %cst_14 = arith.constant 0.000000e+00 : f32
      %16 = vector.broadcast %cst_14 : f32 to vector<256x128xf32>
      %17 = arith.maximumf %15, %16 : vector<256x128xf32>
      %18 = arith.truncf %17 : vector<256x128xf32> to vector<256x128xbf16>
      %c0_15 = arith.constant 0 : index
      %c0_16 = arith.constant 0 : index
      %19 = vector.load %arg6[%c0_15, %c0_16] : memref<256x128xbf16, #tpu.memory_space<vmem>>, vector<256x128xbf16>
      tpu.vector_store %arg6[%c0_15, %c0_16], %18 {strides = array<i32>} : memref<256x128xbf16, #tpu.memory_space<vmem>>, vector<256x128xbf16>,
    } else {
    }
    return
  }
  func.func @transform_0(%arg0: i32, %arg1: i32, %arg2: i32) -> (i32, i32) {
    %c0_i32 = arith.constant 0 : i32
    return %arg0, %arg2 : i32, i32
  }
  func.func @transform_1(%arg0: i32, %arg1: i32, %arg2: i32) -> (i32, i32) {
    %c0_i32 = arith.constant 0 : i32
    return %arg2, %arg1 : i32, i32
  }
  func.func @transform_2(%arg0: i32, %arg1: i32, %arg2: i32) -> (i32, i32) {
    %c0_i32 = arith.constant 0 : i32
    %c0_i32_0 = arith.constant 0 : i32
    return %c0_i32, %arg1 : i32, i32
  }
  func.func @transform_3(%arg0: i32, %arg1: i32, %arg2: i32) -> (i32, i32) {
    %c0_i32 = arith.constant 0 : i32
    return %arg0, %arg1 : i32, i32
  }
}

</mosaic_0001>

<bundles_post_ra>
// kernel: tpu_custom_call.1
= control target key start
LH: loop header
LB: loop body
LE: loop exit
PB: predicated region body
PF: predicated region fallthrough
CT: control target
= control target key end

     0   :  { %8 = vsyncpa [#allocation4], 0  ;;  %s2075_s0 = inlined_call_operand.hbm [shape: bf16[8192,128], index: 0, kind: input, shape index: {}]   ;;  %s2076_s1 = inlined_call_operand.hbm [shape: bf16[128,128], index: 1, kind: input, shape index: {}]   ;;  %s2077_s2 = inlined_call_operand.hbm [shape: f32[1,128], index: 2, kind: input, shape index: {}]   ;;  %s2078_s3 = inlined_call_operand.hbm [shape: bf16[8192,128], index: 3, kind: output, shape index: {}]  }
   0x1   :  { %10 = vsyncpa [#allocation4 + $0x1], 0 }
   0x2   :  { %11 = vsyncpa [#allocation7], 0 }
   0x3   :  { %12 = vsyncpa [#allocation5], 0 }
   0x4   :  { %14 = vsyncpa [#allocation5 + $0x1], 0  ;;  %s1747_s12 = smov 0   ;;  %s1749_s13 = smov 0  }
   0x5   :  { %s1751_s14 = smov 0   ;;  %s1753_s15 = smov 0  }
   0x6   :  { %s1755_s16 = smov 0   ;;  %s1757_s17 = smov 0  }
   0x7 LB: > { %s1141_s18 = sadd.s32 4294967295, %s1717_s17   ;;  %s1142_s19 = sadd.s32 4294967294, %s1717_s17   ;;  %s1717_s17 = sphi %s1757_s17, %s20_s17   ;;  %s1713_s16 = sphi %s1755_s16, %s2100_s16   ;;  %s1709_s15 = sphi %s1753_s15, %s2099_s15   ;;  %s1705_s14 = sphi %s1751_s14, %s2098_s14   ;;  %s1701_s13 = sphi %s1749_s13, %s2097_s13   ;;  %s1697_s12 = sphi %s1747_s12, %s2096_s12  }
   0x8   : > { %p61_p0 = scmp.ne.s32.totalorder %s1701_s13, %s1697_s12  ;;  %p1781_p1 = scmp.eq.s32.totalorder %s1141_s18, 0 }
   0x9   : > { %p1785_p2 = scmp.eq.s32.totalorder %s1141_s18, 31  ;;  %p147_p3 = scmp.eq.s32.totalorder %s1142_s19, 31 }
   0xa   : > { %s2083_s20 = scalar_select %p1781_p1, 1, 0 }
   0xb   : > { %s2084_s21 = scalar_select %p1785_p2, 1, 0 }
   0xc   : > { %p1791_p4 = por %p1781_p1, %p61_p0  ;;  %p1143_p5 = scmp.ge.s32.totalorder %s1717_s17, 1 }
   0xd   : > { %p1796_p6 = por %p147_p3, %p61_p0  ;;  %p154_p7 = scmp.lt.s32.totalorder %s1717_s17, 33 }
   0xe   : > { %s2085_s22 = scalar_select %p1791_p4, 1, 0 }
   0xf   : > { %s2086_s23 = scalar_select %p1796_p6, 1, 0 }
  0x10   : > { %p1801_p8 = pnand %p1143_p5, %p154_p7  ;;  %s1719_s25 = smov [#allocation6]  }
  0x11   : > { %s170_s26 = sshll.u32 %s1719_s25, 4  ;;  %s1720_s28 = smov [#allocation8]   ;;  %s171_s26 = int_to_ptr.vmem [resolvable:$true] %s170_s26 }
  0x12   : > { %s2087_s24 = scalar_select %p1801_p8, 1, 0 }
  0x13   : > { %p1446_p9 = pneg %p1801_p8  ;;  %s186_s29 = sshll.u32 %s1720_s28, 4  ;;  %s1813_s29 = int_to_ptr.vmem [resolvable:$true] %s186_s29 }
  0x14   : > { %s1545_s5 = scalar_lea.hbm %s2076_s1, 1024 }
  0x15   : > { %p1809_p10 = pnand %p1446_p9, %p1781_p1  ;;  %p1546_p11 = scmp.ne.s32.totalorder %s2076_s1, %s1545_s5 }
  0x16   : > { %p1552_p3 = scmp.lt.u32.totalorder %s1545_s5, %s2076_s1 }
  0x17   : > { %p1547_p12 = pneg %p1809_p10 }
  0x19   : > { %p1548_p13 = pnand %p1547_p12, %p1546_p11 }
  0x1b   : > { %p1549_p0 = pneg %p1548_p13 }
  0x1d   : > { %p1554_p5 = pnand %p1552_p3, %p1549_p0 }
  0x1f   : > { %1557 = shalt.err (!%p1554_p5)
}
  0x20   : > { %s1558_s10 = scalar_lea.vmem %s171_s26, 1024  ;;  %p1566_p1 = scmp.lt.s32.totalorder %s171_s26, %s171_s26 }
  0x21   : > { %p1559_p7 = scmp.ne.s32.totalorder %s171_s26, %s1558_s10  ;;  %p1567_p4 = scmp.lt.s32.totalorder %s1558_s10, %s1558_s10 }
  0x23   : > { %p1561_p9 = pnand %p1559_p7, %p1547_p12  ;;  %p1568_p8 = por %p1567_p4, %p1566_p1 }
  0x25   : > { %p1562_p6 = pneg %p1561_p9 }
  0x27   : > { %p1569_p2 = pnand %p1568_p8, %p1562_p6 }
  0x29   : > { %1572 = shalt.err (!%p1569_p2)
}
  0x2a   : > { %s1721_s11 = smov 64   ;;  %s1722_s18 = smov 4  }
  0x2b   : > { %1449 = dma.hbm_to_vmem [thread:$0]  (!%p1809_p10), %s2076_s1, 1024, %s171_s26, [#allocation7], %s1721_s11, %s1721_s11, %s1722_s18  }
  0x2c   : > { %s1573_s4 = scalar_lea.hbm %s2077_s2, 16 }
  0x2d   : > { %p1574_p1 = scmp.ne.s32.totalorder %s2077_s2, %s1573_s4  ;;  %p1580_p6 = scmp.lt.u32.totalorder %s1573_s4, %s2077_s2 }
  0x2f   : > { %p1576_p2 = pnand %p1574_p1, %p1547_p12 }
  0x31   : > { %p1577_p4 = pneg %p1576_p2 }
  0x33   : > { %p1582_p8 = pnand %p1580_p6, %p1577_p4 }
  0x35   : > { %1585 = shalt.err (!%p1582_p8)
}
  0x36   : > { %s1586_s26 = scalar_lea.vmem %s1813_s29, 16  ;;  %s1593_s9 = scalar_lea.vmem %s1813_s29, 32 }
  0x37   : > { %p1587_p11 = scmp.ne.s32.totalorder %s1813_s29, %s1586_s26  ;;  %p1594_p3 = scmp.lt.s32.totalorder %s1813_s29, %s1813_s29 }
  0x38   : > { %p1595_p5 = scmp.lt.s32.totalorder %s1593_s9, %s1586_s26 }
  0x39   : > { %p1589_p13 = pnand %p1587_p11, %p1547_p12 }
  0x3a   : > { %p1596_p7 = por %p1595_p5, %p1594_p3 }
  0x3b   : > { %p1590_p0 = pneg %p1589_p13 }
  0x3d   : > { %p1597_p9 = pnand %p1596_p7, %p1590_p0 }
  0x3f   : > { %1600 = shalt.err (!%p1597_p9)
}
  0x40   : > { %1452 = dma.hbm_to_vmem [thread:$0]  (!%p1809_p10), %s2077_s2, 16, %s1813_s29, [#allocation7]  }
  0x41   : > { %s39_s25 = sadd.s32 1, %s1713_s16  ;;  %s48_s28 = sadd.s32 1, %s1705_s14 }
  0x42   : > { %p41_p12 = scmp.ge.s32.totalorder %s39_s25, 32  ;;  %p55_p1 = scmp.ne.s32.totalorder %s1705_s14, %s1701_s13 }
  0x43   : > { %p56_p2 = scmp.eq.s32.totalorder %s1717_s17, 0  ;;  %p1463_p4 = scmp.lt.s32.totalorder %s1717_s17, 32 }
  0x44   : > { %s2102_s25 = smov (%p41_p12, %s39_s25), 0  ;;  %p2089_p8 = scmp.ne.s32.totalorder %s2084_s21, 0 }
  0x45   : > { %p57_p6 = por %p56_p2, %p55_p1  ;;  %s43_s30 = ssub.s32 %s1713_s16, %s2102_s25 }
  0x46   : > { %p1876_p11 = por %p2089_p8, %p55_p1  ;;  %s197_s4 = sand.u32 1, %s1705_s14  }
  0x47   : > { %p46_p13 = scmp.eq.s32.totalorder %s43_s30, 0  ;;  %s1147_s29 = sshll.u32 %s197_s4, 7 }
  0x48   : > { %s1217_s5 = sshll.u32 %s1713_s16, 11  ;;  %s201_s21 = scalar_lea.vmem [#allocation3], %s1147_s29 }
  0x49   : > { %s1885_s6 = scalar_select %p46_p13, %s1705_s14, %s48_s28  }
  0x4a   : > { %s1890_s26 = scalar_lea.hbm %s2075_s0, %s1217_s5  ;;  %s209_s9 = sshll.u32 %s201_s21, 4  ;;  %s1898_s9 = int_to_ptr.vmem [resolvable:$true] %s209_s9 }
  0x4b   : > { %p1894_p10 = pnand %p1463_p4, %p57_p6  ;;  %s1900_s19 = scalar_lea.sflag [#allocation4], %s197_s4 }
  0x4c   : > { %s1601_s28 = scalar_lea.hbm %s1890_s26, 2048  ;;  %s1606_s5 = scalar_lea.hbm %s2075_s0, 65536 }
  0x4d   : > { %p1602_p0 = scmp.ne.s32.totalorder %s1890_s26, %s1601_s28  ;;  %p1603_p3 = pneg %p1894_p10 }
  0x4e   : > { %p1607_p9 = scmp.lt.u32.totalorder %s1890_s26, %s2075_s0  ;;  %p1608_p12 = scmp.lt.u32.totalorder %s1606_s5, %s1601_s28 }
  0x4f   : > { %p1604_p5 = pnand %p1603_p3, %p1602_p0  ;;  %p1610_p2 = scmp.lt.u32.totalorder %s1601_s28, %s1890_s26 }
  0x50   : > { %p1609_p1 = por %p1608_p12, %p1607_p9 }
  0x51   : > { %p1605_p7 = pneg %p1604_p5 }
  0x52   : > { %p1611_p4 = por %p1610_p2, %p1609_p1 }
  0x54   : > { %p1612_p6 = pnand %p1611_p4, %p1605_p7 }
  0x56   : > { %1615 = shalt.err (!%p1612_p6)
}
  0x57   : > { %s1616_s4 = scalar_lea.vmem %s1898_s9, 2048  ;;  %s1723_s21 = smov [#allocation3]  }
  0x58   : > { %p1617_p8 = scmp.ne.s32.totalorder %s1898_s9, %s1616_s4  ;;  %s1621_s30 = sshll.u32 %s1723_s21, 4  ;;  %s1622_s30 = int_to_ptr.vmem [resolvable:$false] %s1621_s30 }
  0x59   : > { %s1623_s29 = scalar_lea.vmem %s1622_s30, 4096  ;;  %p1624_p5 = scmp.lt.s32.totalorder %s1898_s9, %s1622_s30 }
  0x5a   : > { %p1619_p13 = pnand %p1617_p8, %p1603_p3  ;;  %p1625_p9 = scmp.lt.s32.totalorder %s1623_s29, %s1616_s4 }
  0x5c   : > { %p1620_p0 = pneg %p1619_p13  ;;  %p1626_p12 = por %p1625_p9, %p1624_p5 }
  0x5e   : > { %p1627_p1 = pnand %p1626_p12, %p1620_p0 }
  0x60   : > { %1630 = shalt.err (!%p1627_p1)
}
  0x61   : > { %1456 = dma.hbm_to_vmem [thread:$0]  (!%p1894_p10), %s1890_s26, 2048, %s1898_s9, %s1900_s19, %s1721_s11, %s1721_s11, %s1722_s18  }
  0x62   : > { %p2092_p3 = scmp.ne.s32.totalorder %s2087_s24, 0 }
  0x63   : > { %s1934_s28 = sand.u32 (!%p2092_p3), 1, %s1701_s13   ;;  %p2093_p7 = scmp.ne.s32.totalorder (!%p2092_p3), %s2085_s22, 0 }
  0x64   : > { %221 = sbr.rel (%p2092_p3) target bundleno = 404 (0x194), region = 32  ;;  %s1151_s5 = sshll.u32 (!%p2092_p3), %s1934_s28, 7 }
  0x65   : > { %s224_s7 = scalar_lea.sflag (!%p2092_p3), [#allocation4], %s1934_s28  ;;  %s1940_s10 = scalar_lea.vmem (!%p2092_p3), [#allocation3], %s1151_s5 }
  0x6b   : > { %1684 = dma.done.wait (%p2093_p7), %s224_s7, 2048  }
  0x6c   : > { %1686 = vsyncadd (%p2093_p7), %s224_s7, 4294965248  ;;  %p2094_p10 = scmp.ne.s32.totalorder %s2083_s20, 0 }
  0x6e   : > { %1688 = dma.done.wait (%p2094_p10), [#allocation7], 1040  }
  0x6f   : > { %1690 = vsyncadd (%p2094_p10), [#allocation7], 4294966256  ;;  %v1521_v0 = vld [vmem:[#allocation6] sm:$0xff]   ;;  %v1522_v1 = vld [vmem:[#allocation6 + $0x8] sm:$0xff]   ;;  %s1978_s20 = scalar_lea.vmem [#allocation9], %s1151_s5  ;;  %s1250_s22 = sshll.u32 %s1709_s15, 11 }
  0x70   : > { %1370 = vmatprep.subr.bf16.mxu0 %v1521_v0  ;;  %1418 = vmatprep.subr.bf16.mxu1 %v1521_v0  ;;  %v1523_v2 = vld [vmem:[#allocation6 + $0x10] sm:$0xff]   ;;  %v1524_v3 = vld [vmem:[#allocation6 + $0x18] sm:$0xff]   ;;  %v1529_v4 = vld [vmem:[%s1940_s10] sm:$0xff]   ;;  %s1028_s24 = sshll.u32 %s1978_s20, 4  ;;  %s2021_s15 = scalar_lea.hbm %s2078_s3, %s1250_s22  ;;  %s2023_s24 = int_to_ptr.vmem [resolvable:$true] %s1028_s24 }
  0x71   : > { %1371 = vmatpush3.bf16.msra.mxu0 %v1521_v0  ;;  %1426 = vmatpush3.bf16.msra.mxu1 %v1521_v0  ;;  %v1530_v5 = vld [vmem:[%s1940_s10 + $0x40] sm:$0xff]   ;;  %v1526_v7 = vld [vmem:[#allocation6 + $0x28] sm:$0xff]   ;;  %v1527_v8 = vld [vmem:[#allocation6 + $0x30] sm:$0xff]   ;;  %s1014_s26 = scalar_lea.sflag [#allocation5], %s1934_s28  ;;  %s1631_s9 = scalar_lea.vmem %s2023_s24, 2048 }
  0x72   : > { %1372 = vmatprep.subr.bf16.mxu0 %v1522_v1  ;;  %1419 = vmatprep.subr.bf16.mxu1 %v1522_v1  ;;  %v1525_v6 = vld [vmem:[#allocation6 + $0x20] sm:$0xff]   ;;  %v1528_v9 = vld [vmem:[#allocation6 + $0x38] sm:$0xff]   ;;  %v1531_v10 = vld [vmem:[%s1940_s10 + $0x8] sm:$0xff]   ;;  %p1632_p2 = scmp.ne.s32.totalorder %s2023_s24, %s1631_s9  ;;  %s1724_s19 = smov [#allocation9]  }
  0x73   : > { %1386 = vmatprep.mubr.bf16.mxu0 %v1529_v4  ;;  %1402 = vmatprep.mubr.bf16.mxu1 %v1530_v5  ;;  %v1532_v11 = vld [vmem:[%s1940_s10 + $0x48] sm:$0xff]   ;;  %v1533_v12 = vld [vmem:[%s1940_s10 + $0x10] sm:$0xff]   ;;  %v1535_v14 = vld [vmem:[%s1940_s10 + $0x18] sm:$0xff]   ;;  %s1635_s8 = sshll.u32 %s1724_s19, 4  ;;  %s1636_s8 = int_to_ptr.vmem [resolvable:$false] %s1635_s8 }
  0x74   : > { %v1534_v13 = vld [vmem:[%s1940_s10 + $0x50] sm:$0xff]   ;;  %v1536_v15 = vld [vmem:[%s1940_s10 + $0x58] sm:$0xff]   ;;  %v1537_v16 = vld [vmem:[%s1940_s10 + $0x20] sm:$0xff]   ;;  %p1633_p4 = pnand %p1632_p2, %p1876_p11  ;;  %s1637_s4 = scalar_lea.vmem %s1636_s8, 4096 }
  0x75   : > { %1373 = vmatpush3.bf16.msra.mxu0 %v1522_v1  ;;  %1427 = vmatpush3.bf16.msra.mxu1 %v1522_v1  ;;  %v1538_v17 = vld [vmem:[%s1940_s10 + $0x60] sm:$0xff]   ;;  %v1539_v18 = vld [vmem:[%s1940_s10 + $0x28] sm:$0xff]   ;;  %v1541_v20 = vld [vmem:[%s1940_s10 + $0x30] sm:$0xff]   ;;  %p1638_p8 = scmp.lt.s32.totalorder %s2023_s24, %s1636_s8  ;;  %p1639_p13 = scmp.lt.s32.totalorder %s1637_s4, %s1631_s9 }
  0x76   : > { %1374 = vmatprep.subr.bf16.mxu0 %v1523_v2  ;;  %1420 = vmatprep.subr.bf16.mxu1 %v1523_v2  ;;  %v1540_v19 = vld [vmem:[%s1940_s10 + $0x68] sm:$0xff]   ;;  %v1542_v21 = vld [vmem:[%s1940_s10 + $0x70] sm:$0xff]   ;;  %v1543_v22 = vld [vmem:[%s1940_s10 + $0x38] sm:$0xff]   ;;  %p1634_p6 = pneg %p1633_p4 }
  0x77   : > { %v1544_v23 = vld [vmem:[%s1940_s10 + $0x78] sm:$0xff]   ;;  %v1966_v24 = vld [vmem:[#allocation8] ss:$0 sm:$0xff]  ;;  %p1640_p0 = por %p1639_p13, %p1638_p8 }
  0x79   : > { %1375 = vmatpush3.bf16.msra.mxu0 %v1523_v2  ;;  %1428 = vmatpush3.bf16.msra.mxu1 %v1523_v2  ;;  %p1641_p5 = pnand %p1640_p0, %p1634_p6 }
  0x7a   : > { %1376 = vmatprep.subr.bf16.mxu0 %v1524_v3  ;;  %1421 = vmatprep.subr.bf16.mxu1 %v1524_v3 }
  0x7d   : > { %1377 = vmatpush3.bf16.msra.mxu0 %v1524_v3  ;;  %1429 = vmatpush3.bf16.msra.mxu1 %v1524_v3 }
  0x7e   : > { %1378 = vmatprep.subr.bf16.mxu0 %v1525_v6  ;;  %1422 = vmatprep.subr.bf16.mxu1 %v1525_v6 }
  0x81   : > { %1379 = vmatpush3.bf16.msra.mxu0 %v1525_v6  ;;  %1430 = vmatpush3.bf16.msra.mxu1 %v1525_v6 }
  0x82   : > { %1380 = vmatprep.subr.bf16.mxu0 %v1526_v7  ;;  %1423 = vmatprep.subr.bf16.mxu1 %v1526_v7 }
  0x85   : > { %1381 = vmatpush3.bf16.msra.mxu0 %v1526_v7  ;;  %1431 = vmatpush3.bf16.msra.mxu1 %v1526_v7 }
  0x86   : > { %1382 = vmatprep.subr.bf16.mxu0 %v1527_v8  ;;  %1424 = vmatprep.subr.bf16.mxu1 %v1527_v8 }
  0x89   : > { %1383 = vmatpush3.bf16.msra.mxu0 %v1527_v8  ;;  %1432 = vmatpush3.bf16.msra.mxu1 %v1527_v8 }
  0x8a   : > { %1384 = vmatprep.subr.bf16.mxu0 %v1528_v9  ;;  %1425 = vmatprep.subr.bf16.mxu1 %v1528_v9 }
  0x8d   : > { %1385 = vmatpush3.bf16.msra.mxu0 %v1528_v9  ;;  %1433 = vmatpush3.bf16.msra.mxu1 %v1528_v9 }
  0x90   : > { %1387 = vmatmul.mubr.bf16.vlgmr.msra.gmra.mrb[0].mxu0 %v1531_v10  ;;  %1403 = vmatmul.mubr.bf16.vlgmr.msra.gmra.mrb[0].mxu1 %v1532_v11 }
  0x91   : > { %1390 = vmatprep.mubr.bf16.mxu0 %v1533_v12  ;;  %1406 = vmatprep.mubr.bf16.mxu1 %v1534_v13 }
  0x98   : > { %1391 = vmatmul.mubr.bf16.gmra.mrb[4].mxu0 %v1535_v14  ;;  %1407 = vmatmul.mubr.bf16.gmra.mrb[4].mxu1 %v1536_v15 }
  0x99   : > { %1394 = vmatprep.mubr.bf16.mxu0 %v1537_v16  ;;  %1410 = vmatprep.mubr.bf16.mxu1 %v1538_v17 }
  0xa0   : > { %1395 = vmatmul.mubr.bf16.gmra.mrb[8].mxu0 %v1539_v18  ;;  %1411 = vmatmul.mubr.bf16.gmra.mrb[8].mxu1 %v1540_v19 }
  0xa1   : > { %1398 = vmatprep.mubr.bf16.mxu0 %v1541_v20  ;;  %1414 = vmatprep.mubr.bf16.mxu1 %v1542_v21 }
  0xa8   : > { %1399 = vmatmul.mubr.bf16.gmra.mrb[12].mxu0 %v1543_v22  ;;  %1415 = vmatmul.mubr.bf16.gmra.mrb[12].mxu1 %v1544_v23 }
 0x163   : > { %v1388_v25 = vpop.f32.mrb[0].mxu0  ;;  %v1404_v26 = vpop.f32.mrb[0].mxu1 }
 0x164   : > { %v791_v27 = vadd.f32 %v1388_v25, %v1966_v24  ;;  %v807_v28 = vadd.f32 %v1404_v26, %v1966_v24  ;;  %v556_v29 = vpop.f32.mrb[1].mxu0  ;;  %v620_v30 = vpop.f32.mrb[1].mxu1 }
 0x165   : > { %v789_v31 = vadd.f32 %v1966_v24, %v556_v29  ;;  %v805_v32 = vadd.f32 %v1966_v24, %v620_v30  ;;  %v1389_v33 = vpop.f32.mrb[2].mxu0  ;;  %v1405_v34 = vpop.f32.mrb[2].mxu1 }
 0x166   : > { %v792_v35 = vadd.f32 %v1389_v33, %v1966_v24  ;;  %v808_v36 = vadd.f32 %v1405_v34, %v1966_v24  ;;  %v559_v37 = vpop.f32.mrb[3].mxu0  ;;  %v623_v38 = vpop.f32.mrb[3].mxu1  ;;  %v823_v41 = vmax.f32 %v791_v27, 0.0  ;;  %v839_v42 = vmax.f32 %v807_v28, 0.0 }
 0x167   : > { %v790_v39 = vadd.f32 %v1966_v24, %v559_v37  ;;  %v806_v40 = vadd.f32 %v1966_v24, %v623_v38  ;;  %v821_v45 = vmax.f32 %v789_v31, 0.0  ;;  %v837_v46 = vmax.f32 %v805_v32, 0.0 }
 0x168   : > { %v824_v43 = vmax.f32 %v792_v35, 0.0  ;;  %v840_v44 = vmax.f32 %v808_v36, 0.0 }
 0x169   : > { %v822_v47 = vmax.f32 %v790_v39, 0.0  ;;  %v838_v48 = vmax.f32 %v806_v40, 0.0 }
 0x16a   : > { %v1259_v49 = vpack.c.bf16 %v824_v43, %v823_v41  ;;  %v1299_v50 = vpack.c.bf16 %v840_v44, %v839_v42 }
 0x16b   : > { %v1254_v51 = vpack.c.bf16 %v822_v47, %v821_v45  ;;  %v1294_v52 = vpack.c.bf16 %v838_v48, %v837_v46  ;;  %v1392_v53 = vpop.f32.mrb[4].mxu0  ;;  %v1408_v54 = vpop.f32.mrb[4].mxu1 }
 0x16c   : > { %1331 = vst [vmem:[%s1978_s20 + $0x8] sm:$0xff] %v1259_v49   ;;  %1339 = vst [vmem:[%s1978_s20 + $0x48] sm:$0xff] %v1299_v50   ;;  %v795_v55 = vadd.f32 %v1392_v53, %v1966_v24  ;;  %v811_v56 = vadd.f32 %v1408_v54, %v1966_v24  ;;  %v572_v57 = vpop.f32.mrb[5].mxu0  ;;  %v636_v58 = vpop.f32.mrb[5].mxu1 }
 0x16d   : > { %1255 = vst [vmem:[%s1978_s20] sm:$0xff] %v1254_v51   ;;  %1338 = vst [vmem:[%s1978_s20 + $0x40] sm:$0xff] %v1294_v52   ;;  %v793_v59 = vadd.f32 %v1966_v24, %v572_v57  ;;  %v809_v60 = vadd.f32 %v1966_v24, %v636_v58  ;;  %v1393_v61 = vpop.f32.mrb[6].mxu0  ;;  %v1409_v62 = vpop.f32.mrb[6].mxu1 }
 0x16e   : > { %v796_v63 = vadd.f32 %v1393_v61, %v1966_v24  ;;  %v812_v0 = vadd.f32 %v1409_v62, %v1966_v24  ;;  %v575_v1 = vpop.f32.mrb[7].mxu0  ;;  %v639_v2 = vpop.f32.mrb[7].mxu1  ;;  %v827_v5 = vmax.f32 %v795_v55, 0.0  ;;  %v843_v6 = vmax.f32 %v811_v56, 0.0 }
 0x16f   : > { %v794_v3 = vadd.f32 %v1966_v24, %v575_v1  ;;  %v810_v4 = vadd.f32 %v1966_v24, %v639_v2  ;;  %v825_v9 = vmax.f32 %v793_v59, 0.0  ;;  %v841_v10 = vmax.f32 %v809_v60, 0.0 }
 0x170   : > { %v828_v7 = vmax.f32 %v796_v63, 0.0  ;;  %v844_v8 = vmax.f32 %v812_v0, 0.0 }
 0x171   : > { %v826_v11 = vmax.f32 %v794_v3, 0.0  ;;  %v842_v12 = vmax.f32 %v810_v4, 0.0 }
 0x172   : > { %v1269_v13 = vpack.c.bf16 %v828_v7, %v827_v5  ;;  %v1309_v14 = vpack.c.bf16 %v844_v8, %v843_v6 }
 0x173   : > { %v1264_v15 = vpack.c.bf16 %v826_v11, %v825_v9  ;;  %v1304_v16 = vpack.c.bf16 %v842_v12, %v841_v10  ;;  %v1396_v17 = vpop.f32.mrb[8].mxu0  ;;  %v1412_v18 = vpop.f32.mrb[8].mxu1 }
 0x174   : > { %1333 = vst [vmem:[%s1978_s20 + $0x18] sm:$0xff] %v1269_v13   ;;  %1341 = vst [vmem:[%s1978_s20 + $0x58] sm:$0xff] %v1309_v14   ;;  %v799_v19 = vadd.f32 %v1396_v17, %v1966_v24  ;;  %v815_v20 = vadd.f32 %v1412_v18, %v1966_v24  ;;  %v588_v21 = vpop.f32.mrb[9].mxu0  ;;  %v652_v22 = vpop.f32.mrb[9].mxu1 }
 0x175   : > { %1332 = vst [vmem:[%s1978_s20 + $0x10] sm:$0xff] %v1264_v15   ;;  %1340 = vst [vmem:[%s1978_s20 + $0x50] sm:$0xff] %v1304_v16   ;;  %v797_v23 = vadd.f32 %v1966_v24, %v588_v21  ;;  %v813_v25 = vadd.f32 %v1966_v24, %v652_v22  ;;  %v1397_v26 = vpop.f32.mrb[10].mxu0  ;;  %v1413_v27 = vpop.f32.mrb[10].mxu1 }
 0x176   : > { %v800_v28 = vadd.f32 %v1397_v26, %v1966_v24  ;;  %v816_v29 = vadd.f32 %v1413_v27, %v1966_v24  ;;  %v591_v30 = vpop.f32.mrb[11].mxu0  ;;  %v655_v31 = vpop.f32.mrb[11].mxu1  ;;  %v831_v34 = vmax.f32 %v799_v19, 0.0  ;;  %v847_v35 = vmax.f32 %v815_v20, 0.0 }
 0x177   : > { %v798_v32 = vadd.f32 %v1966_v24, %v591_v30  ;;  %v814_v33 = vadd.f32 %v1966_v24, %v655_v31  ;;  %v829_v38 = vmax.f32 %v797_v23, 0.0  ;;  %v845_v39 = vmax.f32 %v813_v25, 0.0 }
 0x178   : > { %v832_v36 = vmax.f32 %v800_v28, 0.0  ;;  %v848_v37 = vmax.f32 %v816_v29, 0.0 }
 0x179   : > { %v830_v40 = vmax.f32 %v798_v32, 0.0  ;;  %v846_v41 = vmax.f32 %v814_v33, 0.0 }
 0x17a   : > { %v1279_v42 = vpack.c.bf16 %v832_v36, %v831_v34  ;;  %v1319_v43 = vpack.c.bf16 %v848_v37, %v847_v35 }
 0x17b   : > { %v1274_v44 = vpack.c.bf16 %v830_v40, %v829_v38  ;;  %v1314_v45 = vpack.c.bf16 %v846_v41, %v845_v39  ;;  %v1400_v46 = vpop.f32.mrb[12].mxu0  ;;  %v1416_v47 = vpop.f32.mrb[12].mxu1 }
 0x17c   : > { %1335 = vst [vmem:[%s1978_s20 + $0x28] sm:$0xff] %v1279_v42   ;;  %1343 = vst [vmem:[%s1978_s20 + $0x68] sm:$0xff] %v1319_v43   ;;  %v803_v48 = vadd.f32 %v1400_v46, %v1966_v24  ;;  %v819_v49 = vadd.f32 %v1416_v47, %v1966_v24  ;;  %v604_v50 = vpop.f32.mrb[13].mxu0  ;;  %v668_v51 = vpop.f32.mrb[13].mxu1 }
 0x17d   : > { %1334 = vst [vmem:[%s1978_s20 + $0x20] sm:$0xff] %v1274_v44   ;;  %1342 = vst [vmem:[%s1978_s20 + $0x60] sm:$0xff] %v1314_v45   ;;  %v801_v52 = vadd.f32 %v1966_v24, %v604_v50  ;;  %v817_v53 = vadd.f32 %v1966_v24, %v668_v51  ;;  %v1401_v54 = vpop.f32.mrb[14].mxu0  ;;  %v1417_v55 = vpop.f32.mrb[14].mxu1 }
 0x17e   : > { %v804_v56 = vadd.f32 %v1401_v54, %v1966_v24  ;;  %v820_v57 = vadd.f32 %v1417_v55, %v1966_v24  ;;  %v607_v58 = vpop.f32.mrb[15].mxu0  ;;  %v671_v59 = vpop.f32.mrb[15].mxu1  ;;  %v835_v62 = vmax.f32 %v803_v48, 0.0  ;;  %v851_v63 = vmax.f32 %v819_v49, 0.0 }
 0x17f   : > { %v802_v60 = vadd.f32 %v1966_v24, %v607_v58  ;;  %v818_v61 = vadd.f32 %v1966_v24, %v671_v59  ;;  %v833_v2 = vmax.f32 %v801_v52, 0.0  ;;  %v849_v3 = vmax.f32 %v817_v53, 0.0 }
 0x180   : > { %v836_v0 = vmax.f32 %v804_v56, 0.0  ;;  %v852_v1 = vmax.f32 %v820_v57, 0.0 }
 0x181   : > { %v834_v4 = vmax.f32 %v802_v60, 0.0  ;;  %v850_v5 = vmax.f32 %v818_v61, 0.0 }
 0x182   : > { %v1289_v6 = vpack.c.bf16 %v836_v0, %v835_v62  ;;  %v1329_v7 = vpack.c.bf16 %v852_v1, %v851_v63 }
 0x183   : > { %v1284_v24 = vpack.c.bf16 %v834_v4, %v833_v2  ;;  %v1324_v8 = vpack.c.bf16 %v850_v5, %v849_v3 }
 0x184   : > { %1337 = vst [vmem:[%s1978_s20 + $0x38] sm:$0xff] %v1289_v6   ;;  %1345 = vst [vmem:[%s1978_s20 + $0x78] sm:$0xff] %v1329_v7  }
 0x185   : > { %1336 = vst [vmem:[%s1978_s20 + $0x30] sm:$0xff] %v1284_v24   ;;  %1344 = vst [vmem:[%s1978_s20 + $0x70] sm:$0xff] %v1324_v8  }
 0x186   : > { %1644 = shalt.err (!%p1641_p5)
}
 0x187   : > { %s1645_s21 = scalar_lea.hbm %s2021_s15, 2048  ;;  %s1649_s5 = scalar_lea.hbm %s2078_s3, 65536 }
 0x188   : > { %p1646_p9 = scmp.ne.s32.totalorder %s2021_s15, %s1645_s21  ;;  %p1650_p3 = scmp.lt.u32.totalorder %s2021_s15, %s2078_s3 }
 0x189   : > { %p1651_p7 = scmp.lt.u32.totalorder %s1649_s5, %s1645_s21  ;;  %p1653_p2 = scmp.lt.u32.totalorder %s1645_s21, %s2021_s15 }
 0x18a   : > { %p1647_p12 = pnand %p1646_p9, %p1876_p11 }
 0x18b   : > { %p1652_p10 = por %p1651_p7, %p1650_p3 }
 0x18c   : > { %p1648_p1 = pneg %p1647_p12 }
 0x18d   : > { %p1654_p4 = por %p1653_p2, %p1652_p10 }
 0x18f   : > { %p1655_p6 = pnand %p1654_p4, %p1648_p1 }
 0x191   : > { %1658 = shalt.err (!%p1655_p6)
}
 0x192   : > { %s1725_s20 = smov 64   ;;  %s1726_s22 = smov 4  }
 0x193   : > { %1444 = dma.vmem_to_hbm [thread:$0]  (%p1876_p11), %s2023_s24, 2048, %s2021_s15, %s1014_s26, %s1725_s20, %s1725_s20, %s1726_s22  }
 0x194 PF: > { %p1466_p8 = scmp.ge.s32.totalorder %s1717_s17, 2  ;;  %s1043_s11 = sand.u32 1, %s1697_s12  }
 0x195   : > { %p2095_p13 = scmp.ne.s32.totalorder %s2086_s23, 0  ;;  %s1044_s18 = scalar_lea.sflag [#allocation5], %s1043_s11 }
 0x197   : > { %p1458_p0 = pnand %p1466_p8, %p2095_p13 }
 0x199   : > { %1692 = dma.done.wait (!%p1458_p0), %s1044_s18, 2048  }
 0x19a   : > { %1694 = vsyncadd (!%p1458_p0), %s1044_s18, 4294965248  ;;  %s20_s17 = sadd.s32 1, %s1717_s17   ;;  %s2096_s12 = smov %s1701_s13 }
 0x19b   : > { %p17_p5 = scmp.ge.s32.totalorder %s20_s17, 34   ;;  %s2097_s13 = smov %s1705_s14 }
 0x19c   : > { %s2098_s14 = smov %s1885_s6  ;;  %s2099_s15 = smov %s1713_s16 }
 0x19d   : > { %s2100_s16 = smov %s2102_s25  ;;  %19 = sbr.rel (!%p17_p5) target bundleno = 7 (0x7), region = 95 }
 0x1a4   :  { %1049 = vsyncpa [#allocation4], 1 }
 0x1a5   :  { %1051 = vsyncpa [#allocation4 + $0x1], 1 }
 0x1a6   :  { %1052 = vsyncpa [#allocation7], 1 }
 0x1a7   :  { %1053 = vsyncpa [#allocation5], 1 }
 0x1a8   :  { %1055 = vsyncpa [#allocation5 + $0x1], 1 }

</bundles_post_ra>
